<compile_context>
chip_gen: v7x
topology: tpu7x:2x2x1
jax: 0.10.0
libtpu: 0.0.40
codegen_flags: <defaults>
</compile_context>

<pallas_src>
import functools

import jax
import jax.numpy as jnp
from jax.experimental import pallas as pl
from jax.experimental.pallas import tpu as pltpu


# ------------------------------ 'add' path --------------------------------- #

def _add_kernel(*refs):
    """Elementwise sum of all input blocks into the output block.

    Mixed input dtypes are promoted in-kernel (sequential jnp promotion, which
    matches PyTorch's pairwise `sum(x)` promotion); the VPU cast is free under
    the HBM roofline, instead of costing an extra wrapper-side HBM read+write
    pass per promoted input.
    """
    *in_refs, out_ref = refs
    acc = in_refs[0][...]
    for r in in_refs[1:]:
        acc = acc + r[...]
    out_ref[...] = acc.astype(out_ref.dtype)


def _vmem_budgets():
    """(vmem_limit_bytes, live_tile_budget_bytes) derived per TPU generation."""
    try:
        vmem_phys = int(pltpu.get_tpu_info().vmem_capacity_bytes)
    except Exception:  # conservative fallback: assume v7x-sized 64 MiB / TC
        vmem_phys = 64 * 1024 * 1024
    if vmem_phys >= 128 * 1024 * 1024:      # v5e / v6e: 128 MiB physical VMEM
        return 64 * 1024 * 1024, 40 * 1024 * 1024
    # v7x-class (64 MiB per TensorCore): leave headroom for Mosaic scratch.
    limit = min(48 * 1024 * 1024, (vmem_phys * 3) // 4)
    return limit, min(32 * 1024 * 1024, (limit * 2) // 3)


def _merge_add_nchw(xs, out_dtype):
    """Tiled, pipelined elementwise sum of identically shaped NCHW arrays."""
    N, C, H, W = xs[0].shape
    K = len(xs)
    vmem_limit, tile_budget = _vmem_budgets()

    # Bytes of one channel-row across all live blocks (K inputs + output),
    # times 2 for double-buffering.
    per_c_bytes = H * W * (sum(jnp.dtype(x.dtype).itemsize for x in xs)
                           + jnp.dtype(out_dtype).itemsize)
    c_budget = max(int(tile_budget // (2 * per_c_bytes)), 1)
    c_tile = max(1, min(C, c_budget))

    # Never collapse to a single non-pipelined block: for anything bigger than
    # ~1 MiB keep >= 8 grid steps (double-buffer overlap + v7x megacore).
    total_in_bytes = sum(int(x.size) * jnp.dtype(x.dtype).itemsize for x in xs)
    min_steps = 8 if total_in_bytes > (1 << 20) else 1
    want_c_tiles = -(-min_steps // N)                      # ceil(min_steps / N)
    if want_c_tiles > 1:
        c_tile = min(c_tile, max(1, -(-C // want_c_tiles)))

    # Prefer an even divisor of C only if it keeps >= 75% of the tile; a single
    # ragged (masked) last block is cheaper than many extra grid steps.
    if C % c_tile != 0:
        lo = max(1, (3 * c_tile + 3) // 4)
        for cand in range(c_tile - 1, lo - 1, -1):
            if C % cand == 0:
                c_tile = cand
                break

    grid = (N, pl.cdiv(C, c_tile))

    total_elems = N * C * H * W
    out_bytes = total_elems * jnp.dtype(out_dtype).itemsize
    cost = pl.CostEstimate(
        flops=(K - 1) * total_elems,
        transcendentals=0,
        bytes_accessed=total_in_bytes + out_bytes,
    )

    # Block keeps the full (H, W) trailing dims -> no reshape in the wrapper,
    # hence no hidden XLA relayout passes; "last two dims equal the full array
    # dims" satisfies the (8, 128) tiling rule for any H, W.
    block = pl.BlockSpec((1, c_tile, H, W), lambda n, c: (n, c, 0, 0))
    return pl.pallas_call(
        _add_kernel,
        out_shape=jax.ShapeDtypeStruct((N, C, H, W), out_dtype),
        grid=grid,
        in_specs=[block] * K,
        out_specs=block,
        compiler_params=pltpu.CompilerParams(
            dimension_semantics=("parallel", "parallel"),
            vmem_limit_bytes=vmem_limit,
        ),
        cost_estimate=cost,
    )(*xs)


# ------------------------------ 'cat' path --------------------------------- #

_CAT_SPLIT_RUN_BYTES = 256 * 1024   # split into per-batch DMAs below this


def _cat_dma_kernel(plan, num_inputs, *refs):
    """Channel concat as direct HBM->HBM DMA copies (no VMEM round trip).

    `plan` entries: (input_idx, batch_idx_or_None, chan_offset, chan_count).
    batch_idx=None copies the whole input with one (strided-dst) DMA; an int
    copies one fully contiguous per-batch slab.  All copies overlap; wait all.
    """
    in_refs = refs[:num_inputs]
    out_ref = refs[num_inputs]
    sem = refs[num_inputs + 1]
    copies = []
    for idx, (i, n, off, c) in enumerate(plan):
        if n is None:
            src = in_refs[i]
            dst = out_ref.at[:, off:off + c, :, :]
        else:
            src = in_refs[i].at[n:n + 1, :, :, :]
            dst = out_ref.at[n:n + 1, off:off + c, :, :]
        cp = pltpu.make_async_copy(src, dst, sem.at[idx])
        cp.start()
        copies.append(cp)
    for cp in copies:
        cp.wait()


def _merge_cat_nchw(xs, out_dtype):
    # TODO(synk): when the concat feeds a single consumer kernel, fuse the
    # channel-offset reads into that kernel instead of materializing the concat
    # (removes the 2x HBM pass entirely).
    N, _, H, W = xs[0].shape
    channels = [int(x.shape[1]) for x in xs]
    out_c = sum(channels)
    itemsize = jnp.dtype(out_dtype).itemsize

    # DMA cannot convert dtypes; cast only inputs that actually differ
    # (a no-op in the common same-dtype case).
    xs = [x if x.dtype == out_dtype else x.astype(out_dtype) for x in xs]

    # Static copy plan: split small strided copies into per-batch contiguous
    # DMAs so the DMA engine gets maximal contiguous descriptors.
    plan = []
    off = 0
    for i, c in enumerate(channels):
        run_bytes = c * H * W * itemsize
        if N > 1 and run_bytes < _CAT_SPLIT_RUN_BYTES:
            for n in range(N):
                plan.append((i, n, off, c))
        else:
            plan.append((i, None, off, c))
        off += c

    total_bytes = sum(int(x.size) for x in xs) * itemsize
    cost = pl.CostEstimate(flops=0, transcendentals=0,
                           bytes_accessed=2 * total_bytes)
    return pl.pallas_call(
        functools.partial(_cat_dma_kernel, tuple(plan), len(xs)),
        out_shape=jax.ShapeDtypeStruct((N, out_c, H, W), out_dtype),
        grid=(1,),
        in_specs=[pl.BlockSpec(memory_space=pl.ANY)] * len(xs),
        out_specs=pl.BlockSpec(memory_space=pl.ANY),
        scratch_shapes=[pltpu.SemaphoreType.DMA((len(plan),))],
        cost_estimate=cost,
    )(*xs)


# ------------------------------- wrapper ------------------------------------ #

def merge_block(xs, policy):
    """Pallas implementation of MergeBlock.forward (NCHW inputs)."""
    if policy not in ('add', 'cat'):
        raise ValueError(
            "`merge_policy` must be one of: ['add', 'cat'], got {}".format(policy))

    xs = [jnp.asarray(x) for x in xs]
    out_dtype = jnp.result_type(*[x.dtype for x in xs])

    if policy == 'add':
        shape = xs[0].shape
        assert all(x.shape == shape for x in xs), \
            "add policy requires same-shaped inputs"
        return _merge_add_nchw(xs, out_dtype)

    # policy == 'cat'
    return _merge_cat_nchw(xs, out_dtype)


# --------------------------------- main ------------------------------------- #

if __name__ == "__main__":
    key = jax.random.PRNGKey(0)
    ks = list(jax.random.split(key, 12))

    # --- policy='add': three same-shaped NCHW feature maps (small) ---
    x_add = [
        jax.random.normal(ks[0], (2, 4, 16, 16), dtype=jnp.float32),
        jax.random.normal(ks[1], (2, 4, 16, 16), dtype=jnp.float32),
        jax.random.normal(ks[2], (2, 4, 16, 16), dtype=jnp.float32),
    ]
    y = jax.block_until_ready(merge_block(x_add, 'add'))
    assert y.shape == (2, 4, 16, 16)
    assert jnp.allclose(y, x_add[0] + x_add[1] + x_add[2], atol=1e-6), \
        "add policy mismatch"

    # --- policy='add': exercises the multi-step pipelined grid ---
    x_add2 = [
        jax.random.normal(ks[3], (2, 64, 64, 64), dtype=jnp.float32),
        jax.random.normal(ks[4], (2, 64, 64, 64), dtype=jnp.float32),
    ]
    y2 = jax.block_until_ready(merge_block(x_add2, 'add'))
    assert jnp.allclose(y2, x_add2[0] + x_add2[1], atol=1e-6), "tiled add mismatch"

    # --- policy='add': ragged channel tiling (masked last block) ---
    x_add3 = [
        jax.random.normal(ks[5], (1, 13, 128, 128), dtype=jnp.float32),
        jax.random.normal(ks[6], (1, 13, 128, 128), dtype=jnp.float32),
    ]
    y3 = jax.block_until_ready(merge_block(x_add3, 'add'))
    assert jnp.allclose(y3, x_add3[0] + x_add3[1], atol=1e-6), "ragged add mismatch"

    # --- policy='add': mixed dtypes, promotion happens inside the kernel ---
    x_add4 = [
        jax.random.normal(ks[7], (2, 8, 32, 128), dtype=jnp.bfloat16),
        jax.random.normal(ks[8], (2, 8, 32, 128), dtype=jnp.float32),
    ]
    y4 = jax.block_until_ready(merge_block(x_add4, 'add'))
    ref4 = x_add4[0].astype(jnp.float32) + x_add4[1]
    assert y4.dtype == jnp.float32
    assert jnp.allclose(y4, ref4, atol=1e-6), "mixed-dtype add mismatch"

    # --- policy='cat': small per-input runs -> per-batch contiguous DMAs ---
    x_cat = [
        jax.random.normal(ks[9], (2, 4, 16, 16), dtype=jnp.float32),
        jax.random.normal(ks[10], (2, 6, 16, 16), dtype=jnp.float32),
    ]
    y_cat = jax.block_until_ready(merge_block(x_cat, 'cat'))
    assert y_cat.shape == (2, 10, 16, 16)
    assert jnp.array_equal(y_cat, jnp.concatenate(x_cat, axis=1)), \
        "cat policy mismatch"

    # --- policy='cat': larger runs -> whole-input DMA path (mixed plan) ---
    kk = jax.random.split(ks[11], 2)
    x_cat2 = [
        jax.random.normal(kk[0], (2, 8, 64, 128), dtype=jnp.float32),
        jax.random.normal(kk[1], (2, 4, 64, 128), dtype=jnp.float32),
    ]
    y_cat2 = jax.block_until_ready(merge_block(x_cat2, 'cat'))
    assert y_cat2.shape == (2, 12, 64, 128)
    assert jnp.array_equal(y_cat2, jnp.concatenate(x_cat2, axis=1)), \
        "cat (large) mismatch"

    print("KERNEL_OK")
</pallas_src>

<mosaic_0001>
module attributes {stable_mosaic.version = 11 : i64} {
  func.func @_add_kernel(%arg0: i32, %arg1: i32, %arg2: memref<1x4x16x16xf32, #tpu.memory_space<vmem>>, %arg3: memref<1x4x16x16xf32, #tpu.memory_space<vmem>>, %arg4: memref<1x4x16x16xf32, #tpu.memory_space<vmem>>, %arg5: memref<1x4x16x16xf32, #tpu.memory_space<vmem>>) attributes {dimension_semantics = [#tpu.dimension_semantics<parallel>, #tpu.dimension_semantics<parallel>], iteration_bounds = array<i64: 2, 1>, scalar_prefetch = 0 : i64, scratch_operands = 0 : i64, tpu.core_type = #tpu.core_type<tc>, window_params = [{transform_indices = @transform_0, window_bounds = array<i64: 1, 4, 16, 16>}, {transform_indices = @transform_1, window_bounds = array<i64: 1, 4, 16, 16>}, {transform_indices = @transform_2, window_bounds = array<i64: 1, 4, 16, 16>}, {transform_indices = @transform_3, window_bounds = array<i64: 1, 4, 16, 16>}]} {
    %c0 = arith.constant 0 : index
    %c0_0 = arith.constant 0 : index
    %c0_1 = arith.constant 0 : index
    %c0_2 = arith.constant 0 : index
    %0 = vector.load %arg2[%c0, %c0_0, %c0_1, %c0_2] : memref<1x4x16x16xf32, #tpu.memory_space<vmem>>, vector<1x4x16x16xf32>
    %c0_3 = arith.constant 0 : index
    %c0_4 = arith.constant 0 : index
    %c0_5 = arith.constant 0 : index
    %c0_6 = arith.constant 0 : index
    %1 = vector.load %arg3[%c0_3, %c0_4, %c0_5, %c0_6] : memref<1x4x16x16xf32, #tpu.memory_space<vmem>>, vector<1x4x16x16xf32>
    %2 = arith.addf %0, %1 : vector<1x4x16x16xf32>
    %c0_7 = arith.constant 0 : index
    %c0_8 = arith.constant 0 : index
    %c0_9 = arith.constant 0 : index
    %c0_10 = arith.constant 0 : index
    %3 = vector.load %arg4[%c0_7, %c0_8, %c0_9, %c0_10] : memref<1x4x16x16xf32, #tpu.memory_space<vmem>>, vector<1x4x16x16xf32>
    %4 = arith.addf %2, %3 : vector<1x4x16x16xf32>
    %c0_11 = arith.constant 0 : index
    %c0_12 = arith.constant 0 : index
    %c0_13 = arith.constant 0 : index
    %c0_14 = arith.constant 0 : index
    %5 = vector.load %arg5[%c0_11, %c0_12, %c0_13, %c0_14] : memref<1x4x16x16xf32, #tpu.memory_space<vmem>>, vector<1x4x16x16xf32>
    tpu.vector_store %arg5[%c0_11, %c0_12, %c0_13, %c0_14], %4 {strides = array<i32>} : memref<1x4x16x16xf32, #tpu.memory_space<vmem>>, vector<1x4x16x16xf32>,
    return
  }
  func.func @transform_0(%arg0: i32, %arg1: i32) -> (i32, i32, i32, i32) {
    %c0_i32 = arith.constant 0 : i32
    %c0_i32_0 = arith.constant 0 : i32
    %c0_i32_1 = arith.constant 0 : i32
    return %arg0, %arg1, %c0_i32, %c0_i32_0 : i32, i32, i32, i32
  }
  func.func @transform_1(%arg0: i32, %arg1: i32) -> (i32, i32, i32, i32) {
    %c0_i32 = arith.constant 0 : i32
    %c0_i32_0 = arith.constant 0 : i32
    %c0_i32_1 = arith.constant 0 : i32
    return %arg0, %arg1, %c0_i32, %c0_i32_0 : i32, i32, i32, i32
  }
  func.func @transform_2(%arg0: i32, %arg1: i32) -> (i32, i32, i32, i32) {
    %c0_i32 = arith.constant 0 : i32
    %c0_i32_0 = arith.constant 0 : i32
    %c0_i32_1 = arith.constant 0 : i32
    return %arg0, %arg1, %c0_i32, %c0_i32_0 : i32, i32, i32, i32
  }
  func.func @transform_3(%arg0: i32, %arg1: i32) -> (i32, i32, i32, i32) {
    %c0_i32 = arith.constant 0 : i32
    %c0_i32_0 = arith.constant 0 : i32
    %c0_i32_1 = arith.constant 0 : i32
    return %arg0, %arg1, %c0_i32, %c0_i32_0 : i32, i32, i32, i32
  }
}

</mosaic_0001>

<bundles_post_ra>
// kernel: tpu_custom_call.1
= control target key start
LH: loop header
LB: loop body
LE: loop exit
PB: predicated region body
PF: predicated region fallthrough
CT: control target
= control target key end

     0   :  { %s1143_s0 = inlined_call_operand.hbm [shape: f32[2,4,16,16], index: 0, kind: input, shape index: {}]   ;;  %s1144_s1 = inlined_call_operand.hbm [shape: f32[2,4,16,16], index: 1, kind: input, shape index: {}]   ;;  %s1145_s2 = inlined_call_operand.hbm [shape: f32[2,4,16,16], index: 2, kind: input, shape index: {}]   ;;  %s1146_s3 = inlined_call_operand.hbm [shape: f32[2,4,16,16], index: 3, kind: output, shape index: {}]  }
   0x1   :  { %1156 = sst [smem:[#allocation15_spill]] %s1144_s1 }
   0x2   :  { %8 = vsyncpa [#allocation3], 0 }
   0x3   :  { %10 = vsyncpa [#allocation3 + $0x1], 0 }
   0x4   :  { %11 = vsyncpa [#allocation6], 0 }
   0x5   :  { %13 = vsyncpa [#allocation6 + $0x1], 0 }
   0x6   :  { %14 = vsyncpa [#allocation4], 0 }
   0x7   :  { %16 = vsyncpa [#allocation4 + $0x1], 0  ;;  %s810_s12 = smov 0   ;;  %s812_s13 = smov 0  }
   0x8   :  { %s814_s14 = smov 0   ;;  %s816_s15 = smov 0  }
   0x9   :  { %s818_s16 = smov 0   ;;  %s820_s17 = smov 0  }
   0xa LB: > { %1157 = sst [smem:[#allocation12_spill]] %s776_s16  ;;  %s841_s18 = sadd.s32 4294967295, %s780_s17   ;;  %s780_s17 = sphi %s820_s17, %s22_s17   ;;  %s776_s16 = sphi %s818_s16, %s1180_s16   ;;  %s772_s15 = sphi %s816_s15, %s1179_s15   ;;  %s768_s14 = sphi %s814_s14, %s1183_s14   ;;  %s764_s13 = sphi %s812_s13, %s1182_s13   ;;  %s760_s12 = sphi %s810_s12, %s1181_s12  }
   0xb   : > { %s502_s19 = sadd.s32 4294967294, %s780_s17   ;;  %s34_s20 = sadd.s32 1, %s776_s16 }
   0xc   : > { %s43_s21 = sadd.s32 1, %s768_s14  ;;  %p36_p0 = scmp.ge.s32.totalorder %s34_s20, 2 }
   0xd   : > { %p50_p1 = scmp.ne.s32.totalorder %s768_s14, %s764_s13  ;;  %p51_p2 = scmp.eq.s32.totalorder %s780_s17, 0 }
   0xe   : > { %p56_p3 = scmp.ne.s32.totalorder %s764_s13, %s760_s12  ;;  %s1185_s20 = smov (%p36_p0, %s34_s20), 0 }
   0xf   : > { %1158 = sst [smem:[#allocation13_spill]] %s1185_s20  ;;  %p853_p4 = por %p51_p2, %p50_p1 }
  0x10   : > { %p57_p5 = scmp.eq.s32.totalorder %s841_s18, 0  ;;  %s38_s23 = ssub.s32 %s776_s16, %s1185_s20 }
  0x11   : > { %p138_p6 = scmp.eq.s32.totalorder %s841_s18, 1  ;;  %p41_p7 = scmp.eq.s32.totalorder %s38_s23, 0 }
  0x12   : > { %p861_p8 = por %p57_p5, %p56_p3  ;;  %p144_p10 = scmp.eq.s32.totalorder %s502_s19, 1 }
  0x13   : > { %p865_p9 = por %p138_p6, %p50_p1  ;;  %p550_p13 = scmp.lt.s32.totalorder %s780_s17, 2 }
  0x14   : > { %s1160_s24 = scalar_select %p861_p8, 1, 0 }
  0x15   : > { %s1161_s25 = scalar_select %p865_p9, 1, 0 }
  0x16   : > { %s870_s26 = scalar_select %p41_p7, %s768_s14, %s43_s21  }
  0x17   : > { %p872_p11 = por %p144_p10, %p56_p3  ;;  %s1149_s28 = sand.u32 1, %s768_s14  }
  0x18   : > { %1162 = sst [smem:[#allocation14_spill]] %s870_s26  ;;  %s881_s29 = sshll.u32 %s1149_s28, 6 }
  0x19   : > { %s1163_s27 = scalar_select %p872_p11, 1, 0 }
  0x1a   : > { %s884_s30 = sshll.u32 %s776_s16, 10  ;;  %p888_p0 = pnand %p550_p13, %p853_p4 }
  0x1b   : > { %s188_s5 = sand.u32 1, %s780_s17   ;;  %s1165_s1 = sld [smem:[#allocation15_spill]] }
  0x1c   : > { %s192_s9 = scalar_lea.vmem [#allocation5], %s881_s29  ;;  %s904_s11 = scalar_lea.sflag [#allocation6], %s188_s5 }
  0x1d   : > { %s202_s10 = sshll.u32 %s192_s9, 4  ;;  %p910_p4 = pneg %p888_p0  ;;  %s901_s10 = int_to_ptr.vmem [resolvable:$true] %s202_s10 }
  0x21   : > { %s897_s8 = scalar_lea.hbm %s1165_s1, %s884_s30  ;;  %s609_s6 = scalar_lea.hbm %s1165_s1, 2048 }
  0x22   : > { %s604_s19 = scalar_lea.hbm %s897_s8, 1024  ;;  %p610_p7 = scmp.lt.u32.totalorder %s897_s8, %s1165_s1 }
  0x23   : > { %p605_p3 = scmp.ne.s32.totalorder %s897_s8, %s604_s19  ;;  %p611_p10 = scmp.lt.u32.totalorder %s609_s6, %s604_s19 }
  0x24   : > { %p613_p12 = scmp.lt.u32.totalorder %s604_s19, %s897_s8 }
  0x25   : > { %p607_p5 = pnand %p910_p4, %p605_p3  ;;  %p612_p13 = por %p611_p10, %p610_p7 }
  0x27   : > { %p608_p6 = pneg %p607_p5  ;;  %p614_p1 = por %p613_p12, %p612_p13 }
  0x29   : > { %p615_p2 = pnand %p614_p1, %p608_p6 }
  0x2b   : > { %618 = shalt.err (!%p615_p2)
}
  0x2c   : > { %s619_s5 = scalar_lea.vmem %s901_s10, 1024  ;;  %s782_s22 = smov [#allocation5]  }
  0x2d   : > { %p620_p3 = scmp.ne.s32.totalorder %s901_s10, %s619_s5  ;;  %s624_s23 = sshll.u32 %s782_s22, 4  ;;  %s625_s23 = int_to_ptr.vmem [resolvable:$false] %s624_s23 }
  0x2e   : > { %s626_s7 = scalar_lea.vmem %s625_s23, 2048  ;;  %p627_p9 = scmp.lt.s32.totalorder %s901_s10, %s625_s23 }
  0x2f   : > { %p622_p5 = pnand %p620_p3, %p910_p4  ;;  %p628_p8 = scmp.lt.s32.totalorder %s626_s7, %s619_s5 }
  0x31   : > { %p623_p11 = pneg %p622_p5  ;;  %p629_p7 = por %p628_p8, %p627_p9 }
  0x33   : > { %p630_p10 = pnand %p629_p7, %p623_p11 }
  0x35   : > { %633 = shalt.err (!%p630_p10)
}
  0x36   : > { %s1150_s19 = smov 128   ;;  %s1152_s6 = smov 8  }
  0x37   : > { %542 = dma.hbm_to_vmem [thread:$0]  (!%p888_p0), %s897_s8, 1024, %s901_s10, %s904_s11, %s1150_s19, %s1150_s19, %s1152_s6  }
  0x38   : > { %p1167_p8 = scmp.lt.s32.totalorder %s780_s17, 3  ;;  %p1168_p9 = scmp.ge.s32.totalorder %s780_s17, 1 }
  0x39   : > { %s949_s23 = scalar_lea.hbm %s1143_s0, %s884_s30  ;;  %s168_s7 = scalar_lea.vmem [#allocation2], %s881_s29 }
  0x3a   : > { %p941_p11 = pnand %p1168_p9, %p1167_p8  ;;  %s178_s28 = sshll.u32 %s168_s7, 4  ;;  %s952_s28 = int_to_ptr.vmem [resolvable:$true] %s178_s28 }
  0x3b   : > { %s958_s19 = scalar_lea.hbm %s1145_s2, %s884_s30  ;;  %s1170_s6 = sand.u32 1, %s768_s14  }
  0x3c   : > { %s1169_s9 = scalar_select %p941_p11, 1, 0 }
  0x3d   : > { %s962_s1 = scalar_lea.sflag [#allocation3], %s1170_s6  ;;  %s634_s20 = scalar_lea.hbm %s949_s23, 1024 }
  0x3e   : > { %p635_p12 = scmp.ne.s32.totalorder %s949_s23, %s634_s20  ;;  %s639_s16 = scalar_lea.hbm %s1143_s0, 2048 }
  0x3f   : > { %p640_p6 = scmp.lt.u32.totalorder %s949_s23, %s1143_s0  ;;  %p641_p13 = scmp.lt.u32.totalorder %s639_s16, %s634_s20 }
  0x40   : > { %p637_p1 = pnand %p635_p12, %p910_p4  ;;  %p643_p5 = scmp.lt.u32.totalorder %s634_s20, %s949_s23 }
  0x41   : > { %p642_p3 = por %p641_p13, %p640_p6 }
  0x42   : > { %p638_p2 = pneg %p637_p1 }
  0x43   : > { %p644_p7 = por %p643_p5, %p642_p3 }
  0x45   : > { %p645_p10 = pnand %p644_p7, %p638_p2 }
  0x47   : > { %648 = shalt.err (!%p645_p10)
}
  0x48   : > { %s649_s30 = scalar_lea.vmem %s952_s28, 1024  ;;  %s785_s6 = smov [#allocation2]  }
  0x49   : > { %p650_p8 = scmp.ne.s32.totalorder %s952_s28, %s649_s30  ;;  %s654_s8 = sshll.u32 %s785_s6, 4  ;;  %s655_s8 = int_to_ptr.vmem [resolvable:$false] %s654_s8 }
  0x4a   : > { %s656_s26 = scalar_lea.vmem %s655_s8, 2048  ;;  %p657_p1 = scmp.lt.s32.totalorder %s952_s28, %s655_s8 }
  0x4b   : > { %p652_p9 = pnand %p650_p8, %p910_p4  ;;  %p658_p11 = scmp.lt.s32.totalorder %s656_s26, %s649_s30 }
  0x4d   : > { %p653_p12 = pneg %p652_p9  ;;  %p659_p6 = por %p658_p11, %p657_p1 }
  0x4f   : > { %p660_p13 = pnand %p659_p6, %p653_p12 }
  0x51   : > { %663 = shalt.err (!%p660_p13)
}
  0x52   : > { %s1171_s16 = smov 8   ;;  %s1172_s20 = smov 128  }
  0x53   : > { %539 = dma.hbm_to_vmem [thread:$0]  (!%p888_p0), %s949_s23, 1024, %s952_s28, %s962_s1, %s1172_s20, %s1172_s20, %s1171_s16  }
  0x54   : > { %s216_s10 = scalar_lea.vmem [#allocation7], %s881_s29  ;;  %s664_s22 = scalar_lea.hbm %s958_s19, 1024 }
  0x55   : > { %s226_s5 = sshll.u32 %s216_s10, 4  ;;  %p665_p11 = scmp.ne.s32.totalorder %s958_s19, %s664_s22  ;;  %s990_s5 = int_to_ptr.vmem [resolvable:$true] %s226_s5 }
  0x56   : > { %s669_s6 = scalar_lea.hbm %s1145_s2, 2048  ;;  %p670_p5 = scmp.lt.u32.totalorder %s958_s19, %s1145_s2 }
  0x57   : > { %p667_p2 = pnand %p665_p11, %p910_p4  ;;  %p671_p7 = scmp.lt.u32.totalorder %s669_s6, %s664_s22 }
  0x58   : > { %p673_p8 = scmp.lt.u32.totalorder %s664_s22, %s958_s19 }
  0x59   : > { %p668_p3 = pneg %p667_p2  ;;  %p672_p10 = por %p671_p7, %p670_p5 }
  0x5b   : > { %p674_p9 = por %p673_p8, %p672_p10 }
  0x5d   : > { %p675_p12 = pnand %p674_p9, %p668_p3 }
  0x5f   : > { %678 = shalt.err (!%p675_p12)
}
  0x60   : > { %s679_s1 = scalar_lea.vmem %s990_s5, 1024  ;;  %s786_s28 = smov [#allocation7]  }
  0x61   : > { %p680_p1 = scmp.ne.s32.totalorder %s990_s5, %s679_s1  ;;  %s684_s29 = sshll.u32 %s786_s28, 4  ;;  %s685_s29 = int_to_ptr.vmem [resolvable:$false] %s684_s29 }
  0x62   : > { %s686_s23 = scalar_lea.vmem %s685_s29, 2048  ;;  %p687_p11 = scmp.lt.s32.totalorder %s990_s5, %s685_s29 }
  0x63   : > { %p682_p6 = pnand %p680_p1, %p910_p4  ;;  %p688_p2 = scmp.lt.s32.totalorder %s686_s23, %s679_s1 }
  0x65   : > { %p683_p13 = pneg %p682_p6  ;;  %p689_p5 = por %p688_p2, %p687_p11 }
  0x67   : > { %p690_p7 = pnand %p689_p5, %p683_p13 }
  0x69   : > { %693 = shalt.err (!%p690_p7)
}
  0x6a   : > { %545 = dma.hbm_to_vmem [thread:$0]  (!%p888_p0), %s958_s19, 1024, %s990_s5, %s904_s11, %s1172_s20, %s1172_s20, %s1171_s16  }
  0x6b   : > { %p1173_p4 = scmp.ne.s32.totalorder %s1169_s9, 0 }
  0x6c   : > { %s1020_s21 = sand.u32 (!%p1173_p4), 1, %s764_s13   ;;  %p1174_p3 = scmp.ne.s32.totalorder (!%p1173_p4), %s1160_s24, 0 }
  0x6d   : > { %238 = sbr.rel (%p1173_p4) target bundleno = 148 (0x94), region = 32  ;;  %s1023_s10 = sshll.u32 (!%p1173_p4), %s1020_s21, 6 }
  0x6e   : > { %s241_s4 = scalar_lea.sflag (!%p1173_p4), [#allocation3], %s1020_s21  ;;  %s1027_s22 = scalar_lea.vmem (!%p1173_p4), [#allocation2], %s1023_s10 }
  0x74   : > { %747 = dma.done.wait (%p1174_p3), %s241_s4, 1024  }
  0x75   : > { %749 = vsyncadd (%p1174_p3), %s241_s4, 4294966272  ;;  %s249_s11 = sand.u32 1, %s841_s18   ;;  %s1035_s9 = scalar_lea.vmem [#allocation5], %s1023_s10 }
  0x76   : > { %s250_s19 = scalar_lea.sflag [#allocation6], %s249_s11 }
  0x77   : > { %751 = dma.done.wait (%p1174_p3), %s250_s19, 2048  }
  0x78   : > { %753 = vsyncadd (%p1174_p3), %s250_s19, 4294965248  ;;  %v299_v0 = vld [vmem:[%s1027_s22] sm:$0xff]  ;;  %s1044_s18 = scalar_lea.vmem [#allocation7], %s1023_s10  ;;  %v300_v4 = vld [vmem:[%s1027_s22 + $0x8] sm:$0xff]  ;;  %vm339_vm0 = vcmask 130048   ;;  %s1060_s24 = scalar_lea.vmem [#allocation8], %s1023_s10 }
  0x79   : > { %v307_v1 = vld [vmem:[%s1035_s9] sm:$0xff]  ;;  %v308_v5 = vld [vmem:[%s1035_s9 + $0x8] sm:$0xff]  ;;  %v301_v8 = vld [vmem:[%s1027_s22 + $0x10] sm:$0xff]  ;;  %s365_s16 = sshll.u32 %s1060_s24, 4  ;;  %s527_s20 = sshll.u32 %s772_s15, 10  ;;  %s1081_s16 = int_to_ptr.vmem [resolvable:$true] %s365_s16 }
  0x7a   : > { %v323_v2 = vld [vmem:[%s1044_s18] sm:$0xff]  ;;  %v315_v3 = vadd.f32 %v307_v1, %v299_v0  ;;  %v324_v6 = vld [vmem:[%s1044_s18 + $0x8] sm:$0xff]  ;;  %v316_v7 = vadd.f32 %v308_v5, %v300_v4  ;;  %v309_v9 = vld [vmem:[%s1035_s9 + $0x10] sm:$0xff]  ;;  %s1088_s7 = scalar_lea.hbm %s1146_s3, %s527_s20  ;;  %s349_s30 = scalar_lea.sflag [#allocation4], %s1020_s21 }
  0x7b   : > { %v325_v10 = vld [vmem:[%s1044_s18 + $0x10] sm:$0xff]  ;;  %v317_v12 = vadd.f32 %v309_v9, %v301_v8  ;;  %v302_v13 = vld [vmem:[%s1027_s22 + $0x18] sm:$0xff]  ;;  %v303_v18 = vld [vmem:[%s1027_s22 + $0x20] sm:$0xff]  ;;  %s694_s6 = scalar_lea.vmem %s1081_s16, 1024  ;;  %p1175_p10 = scmp.ne.s32.totalorder %s1161_s25, 0 }
  0x7c   : > { %v331_v11 = vadd.f32 %v323_v2, %v315_v3  ;;  %v310_v14 = vld [vmem:[%s1035_s9 + $0x18] sm:$0xff]  ;;  %v332_v16 = vadd.f32 %v324_v6, %v316_v7  ;;  %v311_v19 = vld [vmem:[%s1035_s9 + $0x20] sm:$0xff]  ;;  %v304_v23 = vld [vmem:[%s1027_s22 + $0x28] sm:$0xff]  ;;  %p695_p0 = scmp.ne.s32.totalorder %s1081_s16, %s694_s6  ;;  %s787_s8 = smov [#allocation8]  }
  0x7d   : > { %v326_v15 = vld [vmem:[%s1044_s18 + $0x18] sm:$0xff]  ;;  %v318_v17 = vadd.f32 %v310_v14, %v302_v13  ;;  %v327_v20 = vld [vmem:[%s1044_s18 + $0x20] sm:$0xff]  ;;  %v333_v21 = vadd.f32 %v325_v10, %v317_v12  ;;  %v319_v22 = vadd.f32 %v311_v19, %v303_v18  ;;  %v312_v24 = vld [vmem:[%s1035_s9 + $0x28] sm:$0xff]  ;;  %s698_s26 = sshll.u32 %s787_s8, 4  ;;  %s699_s26 = int_to_ptr.vmem [resolvable:$false] %s698_s26 }
  0x7e   : > { %340 = vst.msk [vmem:[%s1060_s24] sm:$0xff] %vm339_vm0, %v331_v11  ;;  %v328_v25 = vld [vmem:[%s1044_s18 + $0x28] sm:$0xff]  ;;  %341 = vst.msk [vmem:[%s1060_s24 + $0x8] sm:$0xff] %vm339_vm0, %v332_v16  ;;  %v320_v27 = vadd.f32 %v312_v24, %v304_v23  ;;  %v305_v28 = vld [vmem:[%s1027_s22 + $0x30] sm:$0xff]  ;;  %p696_p8 = pnand %p695_p0, %p1175_p10  ;;  %s700_s1 = scalar_lea.vmem %s699_s26, 2048 }
  0x7f   : > { %v334_v26 = vadd.f32 %v326_v15, %v318_v17  ;;  %v313_v29 = vld [vmem:[%s1035_s9 + $0x30] sm:$0xff]  ;;  %342 = vst.msk [vmem:[%s1060_s24 + $0x10] sm:$0xff] %vm339_vm0, %v333_v21  ;;  %v335_v31 = vadd.f32 %v327_v20, %v319_v22  ;;  %v306_v33 = vld [vmem:[%s1027_s22 + $0x38] sm:$0xff]  ;;  %p701_p12 = scmp.lt.s32.totalorder %s1081_s16, %s699_s26  ;;  %p702_p1 = scmp.lt.s32.totalorder %s700_s1, %s694_s6 }
  0x80   : > { %v329_v30 = vld [vmem:[%s1044_s18 + $0x30] sm:$0xff]  ;;  %v321_v32 = vadd.f32 %v313_v29, %v305_v28  ;;  %v314_v34 = vld [vmem:[%s1035_s9 + $0x38] sm:$0xff]  ;;  %v336_v36 = vadd.f32 %v328_v25, %v320_v27  ;;  %p697_p9 = pneg %p696_p8 }
  0x81   : > { %v330_v35 = vld [vmem:[%s1044_s18 + $0x38] sm:$0xff]  ;;  %343 = vst.msk [vmem:[%s1060_s24 + $0x18] sm:$0xff] %vm339_vm0, %v334_v26  ;;  %v322_v37 = vadd.f32 %v314_v34, %v306_v33  ;;  %344 = vst.msk [vmem:[%s1060_s24 + $0x20] sm:$0xff] %vm339_vm0, %v335_v31  ;;  %p703_p6 = por %p702_p1, %p701_p12 }
  0x82   : > { %v337_v38 = vadd.f32 %v329_v30, %v321_v32  ;;  %345 = vst.msk [vmem:[%s1060_s24 + $0x28] sm:$0xff] %vm339_vm0, %v336_v36 }
  0x83   : > { %v338_v39 = vadd.f32 %v330_v35, %v322_v37  ;;  %p704_p13 = pnand %p703_p6, %p697_p9 }
  0x84   : > { %346 = vst.msk [vmem:[%s1060_s24 + $0x30] sm:$0xff] %vm339_vm0, %v337_v38 }
  0x85   : > { %347 = vst.msk [vmem:[%s1060_s24 + $0x38] sm:$0xff] %vm339_vm0, %v338_v39 }
  0x86   : > { %707 = shalt.err (!%p704_p13)
}
  0x87   : > { %s708_s28 = scalar_lea.hbm %s1088_s7, 1024  ;;  %s712_s10 = scalar_lea.hbm %s1146_s3, 2048 }
  0x88   : > { %p709_p11 = scmp.ne.s32.totalorder %s1088_s7, %s708_s28  ;;  %p713_p7 = scmp.lt.u32.totalorder %s1088_s7, %s1146_s3 }
  0x89   : > { %p714_p4 = scmp.lt.u32.totalorder %s712_s10, %s708_s28  ;;  %p716_p0 = scmp.lt.u32.totalorder %s708_s28, %s1088_s7 }
  0x8a   : > { %p710_p2 = pnand %p709_p11, %p1175_p10 }
  0x8b   : > { %p715_p3 = por %p714_p4, %p713_p7 }
  0x8c   : > { %p711_p5 = pneg %p710_p2 }
  0x8d   : > { %p717_p8 = por %p716_p0, %p715_p3 }
  0x8f   : > { %p718_p9 = pnand %p717_p8, %p711_p5 }
  0x91   : > { %721 = shalt.err (!%p718_p9)
}
  0x92   : > { %s788_s11 = smov 128   ;;  %s789_s19 = smov 8  }
  0x93   : > { %534 = dma.vmem_to_hbm [thread:$0]  (%p1175_p10), %s1081_s16, 1024, %s1088_s7, %s349_s30, %s788_s11, %s788_s11, %s789_s19  }
  0x94 PF: > { %s380_s9 = sand.u32 1, %s760_s12   ;;  %p1176_p12 = scmp.ne.s32.totalorder %s1163_s27, 0 }
  0x95   : > { %p1177_p1 = scmp.ge.s32.totalorder %s780_s17, 2  ;;  %s381_s18 = scalar_lea.sflag [#allocation4], %s380_s9 }
  0x97   : > { %p547_p6 = pnand %p1177_p1, %p1176_p12 }
  0x99   : > { %755 = dma.done.wait (!%p547_p6), %s381_s18, 1024  }
  0x9a   : > { %757 = vsyncadd (!%p547_p6), %s381_s18, 4294966272  ;;  %s22_s17 = sadd.s32 1, %s780_s17   ;;  %s1178_s24 = sld [smem:[#allocation14_spill]] }
  0x9b   : > { %p19_p13 = scmp.ge.s32.totalorder %s22_s17, 4   ;;  %s1179_s15 = sld [smem:[#allocation12_spill]] }
  0x9c   : > { %s1180_s16 = sld [smem:[#allocation13_spill]]  ;;  %s1181_s12 = smov %s764_s13 }
  0x9d   : > { %s1182_s13 = smov %s768_s14  ;;  %21 = sbr.rel (!%p19_p13) target bundleno = 10 (0xa), region = 101 }
  0xa0   : > { %s1183_s14 = smov %s1178_s24 }
  0xa4   :  { %386 = vsyncpa [#allocation3], 1 }
  0xa5   :  { %388 = vsyncpa [#allocation3 + $0x1], 1 }
  0xa6   :  { %389 = vsyncpa [#allocation6], 1 }
  0xa7   :  { %391 = vsyncpa [#allocation6 + $0x1], 1 }
  0xa8   :  { %392 = vsyncpa [#allocation4], 1 }
  0xa9   :  { %394 = vsyncpa [#allocation4 + $0x1], 1 }

</bundles_post_ra>
